<compile_context>
chip_gen: v7x
topology: tpu7x:2x2x1
jax: 0.10.0
libtpu: 0.0.40
codegen_flags: <defaults>
</compile_context>

<pallas_src>
import functools
from typing import NamedTuple

import jax
import jax.numpy as jnp
from jax.experimental import pallas as pl
from jax.experimental.pallas import tpu as pltpu

_LANE = 128


def _round_up(v, m):
    return -(-v // m) * m


def _sublane(dtype):
    # Sub-32-bit dtypes pack rows along sublanes: bf16 -> 16 rows/vreg, int8/fp8 -> 32.
    return max(8, 32 // jnp.dtype(dtype).itemsize)


def _vmem_capacity_bytes():
    try:
        info = pltpu.get_tpu_info()
        cap = getattr(info, "vmem_capacity_bytes", None)
        if cap:
            return int(cap)
    except Exception:
        pass
    return 64 * 1024 * 1024  # conservative fallback (v7x: 64 MiB per TensorCore)


def _working_set_bytes(tm, ti, hp, eb):
    """Double-buffered inputs + f32-ish output + f32 accumulator + temp slack."""
    return (2 * eb * (tm * hp)          # x (double-buffered)
            + 2 * eb * (2 * hp * ti)    # stacked gate/up weights (double-buffered)
            + 2 * eb * (ti * hp)        # down weight (double-buffered)
            + 2 * 4 * (tm * hp)         # output (assume f32, double-buffered)
            + 4 * tm * hp               # f32 accumulator scratch
            + 16 * tm * ti)             # in-flight (tm, ti) gate/up/fusion temporaries


class _MLPConfig(NamedTuple):
    hidden: int
    inter: int
    hidden_p: int
    inter_p: int
    tm_max: int
    ti: int
    vmem_limit: int
    compute_dtype_name: str


class Qwen2MLPParams(NamedTuple):
    wgu: jax.Array   # (2, Hp, Ip) stacked, K-major gate/up weights (compute dtype)
    wd: jax.Array    # (Ip, Hp)   K-major down weight (compute dtype)
    cfg: _MLPConfig


def qwen2_mlp_prepare_weights(w_gate, w_up, w_down, *,
                              compute_dtype=jnp.bfloat16,
                              tm_max=None, ti=None):
    """One-time weight prep: cast, transpose to K-major, pad, stack; pick tiles."""
    cdt = jnp.dtype(compute_dtype)
    eb = cdt.itemsize
    I, H = w_gate.shape
    assert w_up.shape == (I, H) and w_down.shape == (H, I)

    hp = _round_up(H, _LANE)
    cap = _vmem_capacity_bytes()
    budget = int(0.65 * cap)

    ti_cands = [t for t in (1024, 512, 256, 128) if t <= _round_up(I, _LANE)]
    if not ti_cands:
        ti_cands = [_round_up(I, _LANE)]
    if ti is not None:
        ti_cands = [int(ti)]
    tm_cands = (512, 256, 128, 64, 32, 16, 8)
    if tm_max is not None:
        tm_cands = tuple(t for t in tm_cands if t <= tm_max) or (int(tm_max),)

    sel = None
    for tm_c in tm_cands:            # prefer large row tile: weights stream (T/tm) times
        for ti_c in ti_cands:        # then largest intermediate tile that fits VMEM
            if _working_set_bytes(tm_c, ti_c, hp, eb) <= budget:
                sel = (tm_c, ti_c)
                break
        if sel is not None:
            break
    if sel is None:
        sel = (tm_cands[-1], ti_cands[-1])
    tm_sel, ti_sel = sel

    ip = _round_up(I, ti_sel)
    need = _working_set_bytes(tm_sel, ti_sel, hp, eb)
    vmem_limit = int(min(max(need + (16 << 20), 32 << 20), int(0.92 * cap)))
    vmem_limit = int(max(vmem_limit, need))

    # Cast -> transpose (K-major) -> zero-pad -> stack.  Zero padding contributes
    # zeros to every contraction and padded output columns are sliced off later.
    wgT = jnp.pad(w_gate.astype(cdt).T, ((0, hp - H), (0, ip - I)))   # (Hp, Ip)
    wuT = jnp.pad(w_up.astype(cdt).T, ((0, hp - H), (0, ip - I)))     # (Hp, Ip)
    wgu = jnp.stack([wgT, wuT], axis=0)                               # (2, Hp, Ip)
    wdT = jnp.pad(w_down.astype(cdt).T, ((0, ip - I), (0, hp - H)))   # (Ip, Hp)

    cfg = _MLPConfig(hidden=H, inter=I, hidden_p=hp, inter_p=ip,
                     tm_max=tm_sel, ti=ti_sel, vmem_limit=vmem_limit,
                     compute_dtype_name=cdt.name)
    return Qwen2MLPParams(wgu=wgu, wd=wdT, cfg=cfg)


# ---------------------------------------------------------------------------
# Fused kernel.  grid = (Tp//tm, Ip//ti); j (intermediate) is the reduction axis.
# Per step:
#   g = x_tile @ WgT[:, jblk]           (tm, ti), f32
#   u = x_tile @ WuT[:, jblk]           (tm, ti), f32
#   f = silu(g) * u  -> compute dtype   (tm, ti)
#   acc(tm, Hp) += f @ WdT[jblk, :]     f32 accumulate
# x_tile and the output block are resident across j (same block index).
# ---------------------------------------------------------------------------
def _qwen2_mlp_kernel(x_ref, wgu_ref, wd_ref, o_ref, acc_ref):
    j = pl.program_id(1)

    @pl.when(j == 0)
    def _():
        acc_ref[...] = jnp.zeros_like(acc_ref)

    x = x_ref[...]
    g = jnp.dot(x, wgu_ref[0], preferred_element_type=jnp.float32)
    u = jnp.dot(x, wgu_ref[1], preferred_element_type=jnp.float32)
    f = (g * jax.nn.sigmoid(g) * u).astype(wd_ref.dtype)
    acc_ref[...] += jnp.dot(f, wd_ref[...], preferred_element_type=jnp.float32)

    @pl.when(j == pl.num_programs(1) - 1)
    def _():
        o_ref[...] = acc_ref[...].astype(o_ref.dtype)


@functools.partial(jax.jit, static_argnums=(3,))
def _qwen2_mlp_forward(x, wgu, wd, cfg):
    orig_shape = x.shape
    orig_dtype = x.dtype
    H, Hp, Ip, ti = cfg.hidden, cfg.hidden_p, cfg.inter_p, cfg.ti
    cdt = jnp.dtype(cfg.compute_dtype_name)
    sub = _sublane(cdt)

    x2d = x.reshape(-1, H).astype(cdt)
    T = x2d.shape[0]

    # Row tiling: near-equal, sublane-aligned blocks; never pad small/ragged T
    # up to a full tm_max block.
    nblk = -(-T // cfg.tm_max)
    tm = _round_up(-(-T // nblk), sub)
    Tp = nblk * tm

    if (Tp, Hp) != (T, H):
        x2d = jnp.pad(x2d, ((0, Tp - T), (0, Hp - H)))

    out2d = pl.pallas_call(
        _qwen2_mlp_kernel,
        out_shape=jax.ShapeDtypeStruct((Tp, Hp), orig_dtype),
        grid_spec=pltpu.PrefetchScalarGridSpec(
            num_scalar_prefetch=0,
            grid=(Tp // tm, Ip // ti),
            in_specs=[
                pl.BlockSpec((tm, Hp), lambda i, j: (i, 0)),        # x rows (resident over j)
                pl.BlockSpec((2, Hp, ti), lambda i, j: (0, 0, j)),  # stacked gate/up weights
                pl.BlockSpec((ti, Hp), lambda i, j: (j, 0)),        # down weight
            ],
            out_specs=pl.BlockSpec((tm, Hp), lambda i, j: (i, 0)),
            scratch_shapes=[pltpu.VMEM((tm, Hp), jnp.float32)],
        ),
        compiler_params=pltpu.CompilerParams(
            dimension_semantics=("parallel", "arbitrary"),
            vmem_limit_bytes=cfg.vmem_limit),
    )(x2d, wgu, wd)

    out2d = out2d[:T, :H]
    return out2d.reshape(orig_shape)


def qwen2_mlp_forward(x, params: Qwen2MLPParams):
    """Production path: weights already prepared once."""
    return _qwen2_mlp_forward(x, params.wgu, params.wd, params.cfg)


def qwen2_mlp_pallas(x, w_gate, w_up, w_down, *, compute_dtype=jnp.bfloat16):
    """Convenience path (does weight prep on the spot; prefer prepare+forward)."""
    params = qwen2_mlp_prepare_weights(w_gate, w_up, w_down,
                                       compute_dtype=compute_dtype)
    return qwen2_mlp_forward(x, params)


def qwen2_mlp_ref(x, w_gate, w_up, w_down):
    g = x @ w_gate.T
    u = x @ w_up.T
    return (g * jax.nn.sigmoid(g) * u) @ w_down.T


if __name__ == "__main__":
    key = jax.random.PRNGKey(0)

    def make_inputs(key, batch, seq, hidden, inter, dtype=jnp.float32):
        kx, kg, ku, kd = jax.random.split(key, 4)
        x = jax.random.normal(kx, (batch, seq, hidden), dtype=dtype)
        bh = 1.0 / (hidden ** 0.5)
        bi = 1.0 / (inter ** 0.5)
        w_gate = jax.random.uniform(kg, (inter, hidden), minval=-bh, maxval=bh, dtype=dtype)
        w_up = jax.random.uniform(ku, (inter, hidden), minval=-bh, maxval=bh, dtype=dtype)
        w_down = jax.random.uniform(kd, (hidden, inter), minval=-bi, maxval=bi, dtype=dtype)
        return x, w_gate, w_up, w_down

    # --- test 1: small, tile-aligned shapes, f32 compute -----------------------
    k1, k2 = jax.random.split(key)
    x, wg, wu, wd = make_inputs(k1, batch=2, seq=8, hidden=128, inter=256)
    out = jax.block_until_ready(
        qwen2_mlp_pallas(x, wg, wu, wd, compute_dtype=jnp.float32))
    ref = qwen2_mlp_ref(x, wg, wu, wd)
    assert out.shape == ref.shape == (2, 8, 128)
    assert jnp.allclose(out, ref, atol=1e-3, rtol=1e-3), "f32 mismatch vs reference"

    # --- test 2: ragged shapes exercise the padding path, f32 compute ----------
    xr, wgr, wur, wdr = make_inputs(k2, batch=1, seq=5, hidden=96, inter=200)
    outr = jax.block_until_ready(
        qwen2_mlp_pallas(xr, wgr, wur, wdr, compute_dtype=jnp.float32))
    refr = qwen2_mlp_ref(xr, wgr, wur, wdr)
    assert outr.shape == refr.shape == (1, 5, 96)
    assert jnp.allclose(outr, refr, atol=1e-3, rtol=1e-3), "ragged mismatch vs reference"

    # --- test 3: default bf16 compute, one-time weight prep + reuse ------------
    params = qwen2_mlp_prepare_weights(wg, wu, wd)           # default bf16
    outb = jax.block_until_ready(qwen2_mlp_forward(x, params))
    assert outb.shape == ref.shape
    assert bool(jnp.all(jnp.isfinite(outb)))
    assert jnp.allclose(outb.astype(jnp.float32), ref, atol=5e-2, rtol=5e-2), \
        "bf16 mismatch vs reference"

    print("KERNEL_OK")
</pallas_src>

<mosaic_0001>
module attributes {stable_mosaic.version = 11 : i64} {
  func.func @_qwen2_mlp_kernel(%arg0: i32, %arg1: i32, %arg2: memref<16x128xf32, #tpu.memory_space<vmem>>, %arg3: memref<2x128x256xf32, #tpu.memory_space<vmem>>, %arg4: memref<256x128xf32, #tpu.memory_space<vmem>>, %arg5: memref<16x128xf32, #tpu.memory_space<vmem>>, %arg6: memref<16x128xf32, #tpu.memory_space<vmem>>) attributes {dimension_semantics = [#tpu.dimension_semantics<parallel>, #tpu.dimension_semantics<arbitrary>], iteration_bounds = array<i64: 1, 1>, scalar_prefetch = 0 : i64, scratch_operands = 1 : i64, tpu.core_type = #tpu.core_type<tc>, window_params = [{transform_indices = @transform_0, window_bounds = array<i64: 16, 128>}, {transform_indices = @transform_1, window_bounds = array<i64: 2, 128, 256>}, {transform_indices = @transform_2, window_bounds = array<i64: 256, 128>}, {transform_indices = @transform_3, window_bounds = array<i64: 16, 128>}]} {
    %c0_i32 = arith.constant 0 : i32
    %0 = arith.cmpi eq, %arg1, %c0_i32 : i32
    %1 = arith.extui %0 : i1 to i32
    %c0_i32_0 = arith.constant 0 : i32
    %2 = arith.cmpi ne, %1, %c0_i32_0 : i32
    scf.if %2 {
      %cst_18 = arith.constant 0.000000e+00 : f32
      %25 = vector.broadcast %cst_18 : f32 to vector<16x128xf32>
      %c0_19 = arith.constant 0 : index
      %c0_20 = arith.constant 0 : index
      %26 = vector.load %arg6[%c0_19, %c0_20] : memref<16x128xf32, #tpu.memory_space<vmem>>, vector<16x128xf32>
      tpu.vector_store %arg6[%c0_19, %c0_20], %25 {strides = array<i32>} : memref<16x128xf32, #tpu.memory_space<vmem>>, vector<16x128xf32>,
    } else {
    }
    %c0 = arith.constant 0 : index
    %c0_1 = arith.constant 0 : index
    %3 = vector.load %arg2[%c0, %c0_1] : memref<16x128xf32, #tpu.memory_space<vmem>>, vector<16x128xf32>
    %c0_2 = arith.constant 0 : index
    %c0_3 = arith.constant 0 : index
    %c0_4 = arith.constant 0 : index
    %4 = vector.load %arg3[%c0_2, %c0_3, %c0_4] : memref<2x128x256xf32, #tpu.memory_space<vmem>>, vector<1x128x256xf32>
    %5 = vector.shape_cast %4 : vector<1x128x256xf32> to vector<128x256xf32>
    %cst = arith.constant dense<0.000000e+00> : vector<16x256xf32>
    %6 = tpu.matmul %3, %5, %cst {dimension_numbers = #tpu.dot_dimension_numbers<[1], [0], [0], [1], [0, 0, 1, 1], [], []>} : vector<16x128xf32>, vector<128x256xf32>, vector<16x256xf32> -> vector<16x256xf32>
    %c1 = arith.constant 1 : index
    %c0_5 = arith.constant 0 : index
    %c0_6 = arith.constant 0 : index
    %7 = vector.load %arg3[%c1, %c0_5, %c0_6] : memref<2x128x256xf32, #tpu.memory_space<vmem>>, vector<1x128x256xf32>
    %8 = vector.shape_cast %7 : vector<1x128x256xf32> to vector<128x256xf32>
    %cst_7 = arith.constant dense<0.000000e+00> : vector<16x256xf32>
    %9 = tpu.matmul %3, %8, %cst_7 {dimension_numbers = #tpu.dot_dimension_numbers<[1], [0], [0], [1], [0, 0, 1, 1], [], []>} : vector<16x128xf32>, vector<128x256xf32>, vector<16x256xf32> -> vector<16x256xf32>
    %10 = arith.negf %6 : vector<16x256xf32>
    %11 = math.exp %10 : vector<16x256xf32>
    %cst_8 = arith.constant 1.000000e+00 : f32
    %12 = vector.broadcast %cst_8 : f32 to vector<16x256xf32>
    %13 = arith.addf %12, %11 : vector<16x256xf32>
    %14 = arith.divf %12, %13 : vector<16x256xf32>
    %15 = arith.mulf %6, %14 : vector<16x256xf32>
    %16 = arith.mulf %15, %9 : vector<16x256xf32>
    %c0_9 = arith.constant 0 : index
    %c0_10 = arith.constant 0 : index
    %17 = vector.load %arg6[%c0_9, %c0_10] : memref<16x128xf32, #tpu.memory_space<vmem>>, vector<16x128xf32>
    %c0_11 = arith.constant 0 : index
    %c0_12 = arith.constant 0 : index
    %18 = vector.load %arg4[%c0_11, %c0_12] : memref<256x128xf32, #tpu.memory_space<vmem>>, vector<256x128xf32>
    %cst_13 = arith.constant dense<0.000000e+00> : vector<16x128xf32>
    %19 = tpu.matmul %16, %18, %cst_13 {dimension_numbers = #tpu.dot_dimension_numbers<[1], [0], [0], [1], [0, 0, 1, 1], [], []>} : vector<16x256xf32>, vector<256x128xf32>, vector<16x128xf32> -> vector<16x128xf32>
    %20 = arith.addf %17, %19 : vector<16x128xf32>
    %c0_14 = arith.constant 0 : index
    %c0_15 = arith.constant 0 : index
    %21 = vector.load %arg6[%c0_14, %c0_15] : memref<16x128xf32, #tpu.memory_space<vmem>>, vector<16x128xf32>
    tpu.vector_store %arg6[%c0_14, %c0_15], %20 {strides = array<i32>} : memref<16x128xf32, #tpu.memory_space<vmem>>, vector<16x128xf32>,
    %c0_i32_16 = arith.constant 0 : i32
    %22 = arith.cmpi eq, %arg1, %c0_i32_16 : i32
    %23 = arith.extui %22 : i1 to i32
    %c0_i32_17 = arith.constant 0 : i32
    %24 = arith.cmpi ne, %23, %c0_i32_17 : i32
    scf.if %24 {
      %c0_18 = arith.constant 0 : index
      %c0_19 = arith.constant 0 : index
      %25 = vector.load %arg6[%c0_18, %c0_19] : memref<16x128xf32, #tpu.memory_space<vmem>>, vector<16x128xf32>
      %c0_20 = arith.constant 0 : index
      %c0_21 = arith.constant 0 : index
      %26 = vector.load %arg5[%c0_20, %c0_21] : memref<16x128xf32, #tpu.memory_space<vmem>>, vector<16x128xf32>
      tpu.vector_store %arg5[%c0_20, %c0_21], %25 {strides = array<i32>} : memref<16x128xf32, #tpu.memory_space<vmem>>, vector<16x128xf32>,
    } else {
    }
    return
  }
  func.func @transform_0(%arg0: i32, %arg1: i32) -> (i32, i32) {
    %c0_i32 = arith.constant 0 : i32
    %c0_i32_0 = arith.constant 0 : i32
    return %arg0, %c0_i32 : i32, i32
  }
  func.func @transform_1(%arg0: i32, %arg1: i32) -> (i32, i32, i32) {
    %c0_i32 = arith.constant 0 : i32
    %c0_i32_0 = arith.constant 0 : i32
    %c0_i32_1 = arith.constant 0 : i32
    return %c0_i32, %c0_i32_0, %arg1 : i32, i32, i32
  }
  func.func @transform_2(%arg0: i32, %arg1: i32) -> (i32, i32) {
    %c0_i32 = arith.constant 0 : i32
    %c0_i32_0 = arith.constant 0 : i32
    return %arg1, %c0_i32 : i32, i32
  }
  func.func @transform_3(%arg0: i32, %arg1: i32) -> (i32, i32) {
    %c0_i32 = arith.constant 0 : i32
    %c0_i32_0 = arith.constant 0 : i32
    return %arg0, %c0_i32 : i32, i32
  }
}

</mosaic_0001>

<bundles_post_ra>
// kernel: _qwen2_mlp_forward.1
= control target key start
LH: loop header
LB: loop body
LE: loop exit
PB: predicated region body
PF: predicated region fallthrough
CT: control target
= control target key end

     0   :  { %8 = vsyncpa [#allocation4], 0  ;;  %s816_s0 = inlined_call_operand.hbm [shape: f32[16,128], index: 0, kind: input, shape index: {}]   ;;  %s817_s1 = inlined_call_operand.hbm [shape: f32[2,128,256], index: 1, kind: input, shape index: {}]   ;;  %s818_s2 = inlined_call_operand.hbm [shape: f32[256,128], index: 2, kind: input, shape index: {}]   ;;  %s819_s3 = inlined_call_operand.hbm [shape: f32[16,128], index: 3, kind: output, shape index: {}]  }
   0x1   :  { %9 = vsyncpa [#allocation7], 0 }
   0x2   :  { %10 = vsyncpa [#allocation5], 0  ;;  %s726_s12 = smov [#allocation6]   ;;  %s632_s16 = scalar_lea.hbm %s817_s1, 8192 }
   0x3   :  { %s28_s13 = sshll.u32 %s726_s12, 4  ;;  %p633_p0 = scmp.ne.s32.totalorder %s817_s1, %s632_s16  ;;  %s29_s13 = int_to_ptr.vmem [resolvable:$true] %s28_s13 }
   0x4   :  { %p636_p1 = scmp.lt.u32.totalorder %s632_s16, %s817_s1 }
   0x6   :  { %p638_p2 = pnand %p636_p1, %p633_p0 }
   0x8   :  { %641 = shalt.err (!%p638_p2)
}
   0x9   :  { %s642_s21 = scalar_lea.vmem %s29_s13, 8192  ;;  %p647_p4 = scmp.lt.s32.totalorder %s29_s13, %s29_s13 }
   0xa   :  { %p643_p3 = scmp.ne.s32.totalorder %s29_s13, %s642_s21  ;;  %p648_p5 = scmp.lt.s32.totalorder %s642_s21, %s642_s21 }
   0xc   :  { %p649_p6 = por %p648_p5, %p647_p4 }
   0xe   :  { %p650_p7 = pnand %p649_p6, %p643_p3 }
  0x10   :  { %653 = shalt.err (!%p650_p7)
}
  0x11   :  { %s727_s22 = smov 256   ;;  %s728_s23 = smov 16  }
  0x12   :  { %34 = dma.hbm_to_vmem [thread:$0]  %s817_s1, 8192, %s29_s13, [#allocation7], %s727_s22, %s727_s22, %s728_s23  }
  0x13   :  { %s729_s26 = smov [#allocation3]   ;;  %s654_s30 = scalar_lea.hbm %s816_s0, 256 }
  0x14   :  { %s16_s27 = sshll.u32 %s729_s26, 4  ;;  %p655_p8 = scmp.ne.s32.totalorder %s816_s0, %s654_s30  ;;  %s17_s27 = int_to_ptr.vmem [resolvable:$true] %s16_s27 }
  0x15   :  { %p658_p9 = scmp.lt.u32.totalorder %s654_s30, %s816_s0 }
  0x17   :  { %p660_p10 = pnand %p658_p9, %p655_p8 }
  0x19   :  { %663 = shalt.err (!%p660_p10)
}
  0x1a   :  { %s664_s8 = scalar_lea.vmem %s17_s27, 256  ;;  %p669_p12 = scmp.lt.s32.totalorder %s17_s27, %s17_s27 }
  0x1b   :  { %p665_p11 = scmp.ne.s32.totalorder %s17_s27, %s664_s8  ;;  %p670_p13 = scmp.lt.s32.totalorder %s664_s8, %s664_s8 }
  0x1d   :  { %p671_p0 = por %p670_p13, %p669_p12 }
  0x1f   :  { %p672_p1 = pnand %p671_p0, %p665_p11 }
  0x21   :  { %675 = shalt.err (!%p672_p1)
}
  0x22   :  { %s730_s1 = smov 128   ;;  %s731_s9 = smov 8  }
  0x23   :  { %22 = dma.hbm_to_vmem [thread:$0]  %s816_s0, 256, %s17_s27, [#allocation4], %s730_s1, %s730_s1, %s731_s9  }
  0x24   :  { %s732_s12 = smov [#allocation8]   ;;  %s676_s16 = scalar_lea.hbm %s818_s2, 4096 }
  0x25   :  { %s40_s13 = sshll.u32 %s732_s12, 4  ;;  %p677_p2 = scmp.ne.s32.totalorder %s818_s2, %s676_s16  ;;  %s41_s13 = int_to_ptr.vmem [resolvable:$true] %s40_s13 }
  0x26   :  { %p680_p3 = scmp.lt.u32.totalorder %s676_s16, %s818_s2 }
  0x28   :  { %p682_p4 = pnand %p680_p3, %p677_p2 }
  0x2a   :  { %685 = shalt.err (!%p682_p4)
}
  0x2b   :  { %s686_s21 = scalar_lea.vmem %s41_s13, 4096  ;;  %p691_p6 = scmp.lt.s32.totalorder %s41_s13, %s41_s13 }
  0x2c   :  { %p687_p5 = scmp.ne.s32.totalorder %s41_s13, %s686_s21  ;;  %p692_p7 = scmp.lt.s32.totalorder %s686_s21, %s686_s21 }
  0x2e   :  { %p693_p8 = por %p692_p7, %p691_p6 }
  0x30   :  { %p694_p9 = pnand %p693_p8, %p687_p5 }
  0x32   :  { %697 = shalt.err (!%p694_p9)
}
  0x33   :  { %46 = dma.hbm_to_vmem [thread:$0]  %s818_s2, 4096, %s41_s13, [#allocation7], %s730_s1, %s730_s1, %s731_s9  }
  0x34   :  { %720 = dma.done.wait [#allocation4], 256  }
  0x35   :  { %721 = vsyncadd [#allocation4], 4294967040 }
  0x36   :  { %722 = dma.done.wait [#allocation7], 12288  }
  0x37   :  { %723 = vsyncadd [#allocation7], 4294955008  ;;  %v733_v0 = vmov 0.0   ;;  %v65_v1 = vld [vmem:[#allocation6 + $0x8] sm:$0xff]  ;;  %v67_v2 = vld [vmem:[#allocation6 + $0x18] sm:$0xff]  ;;  %s734_s2 = smov [#allocation9]  }
  0x38   :  { %160 = vmatprep.mubr.f32.mxu0 %v733_v0  ;;  %270 = vmatprep.mubr.f32.mxu1 %v733_v0  ;;  %v64_v3 = vld [vmem:[#allocation6] sm:$0xff]  ;;  %v495_v4 = vpack.c.bf16 %v67_v2, %v65_v1  ;;  %v66_v5 = vld [vmem:[#allocation6 + $0x10] sm:$0xff]  ;;  %v69_v6 = vld [vmem:[#allocation6 + $0x28] sm:$0xff]  ;;  %s440_s23 = sshll.u32 %s734_s2, 4  ;;  %s441_s23 = int_to_ptr.vmem [resolvable:$true] %s440_s23 }
  0x39   :  { %v71_v7 = vld [vmem:[#allocation6 + $0x38] sm:$0xff]  ;;  %v497_v8 = vpack.c.bf16 %v66_v5, %v64_v3  ;;  %v68_v10 = vld [vmem:[#allocation6 + $0x20] sm:$0xff]  ;;  %v70_v11 = vld [vmem:[#allocation6 + $0x30] sm:$0xff]  ;;  %s698_s24 = scalar_lea.vmem %s441_s23, 256  ;;  %p703_p11 = scmp.lt.s32.totalorder %s441_s23, %s441_s23 }
  0x3a   :  { %v499_v9 = vpack.c.bf16 %v71_v7, %v69_v6  ;;  %v73_v12 = vld [vmem:[#allocation6 + $0x48] sm:$0xff]  ;;  %496 = vmatprep.subr.bf16.mxu0 %v495_v4  ;;  %v75_v13 = vld [vmem:[#allocation6 + $0x58] sm:$0xff]  ;;  %v501_v14 = vpack.c.bf16 %v70_v11, %v68_v10  ;;  %v72_v16 = vld [vmem:[#allocation6 + $0x40] sm:$0xff]  ;;  %p699_p10 = scmp.ne.s32.totalorder %s441_s23, %s698_s24  ;;  %p704_p12 = scmp.lt.s32.totalorder %s698_s24, %s698_s24 }
  0x3b   :  { %498 = vmatpush1.bf16.msra.mxu0 %v497_v8  ;;  %v503_v15 = vpack.c.bf16 %v75_v13, %v73_v12  ;;  %v74_v17 = vld [vmem:[#allocation6 + $0x50] sm:$0xff]  ;;  %v77_v18 = vld [vmem:[#allocation6 + $0x68] sm:$0xff]  ;;  %v79_v19 = vld [vmem:[#allocation6 + $0x78] sm:$0xff] }
  0x3c   :  { %500 = vmatprep.subr.bf16.mxu0 %v499_v9  ;;  %v505_v20 = vpack.c.bf16 %v74_v17, %v72_v16  ;;  %v76_v21 = vld [vmem:[#allocation6 + $0x60] sm:$0xff]  ;;  %v507_v22 = vpack.c.bf16 %v79_v19, %v77_v18  ;;  %v78_v23 = vld [vmem:[#allocation6 + $0x70] sm:$0xff]  ;;  %v175_v24 = vld [vmem:[#allocation6 + $0x108] sm:$0xff]  ;;  %p705_p13 = por %p704_p12, %p703_p11 }
  0x3d   :  { %v177_v25 = vld [vmem:[#allocation6 + $0x118] sm:$0xff]  ;;  %v81_v26 = vld [vmem:[#allocation6 + $0x88] sm:$0xff]  ;;  %v174_v29 = vld [vmem:[#allocation6 + $0x100] sm:$0xff]  ;;  %v509_v32 = vpack.c.bf16 %v78_v23, %v76_v21 }
  0x3e   :  { %v83_v27 = vld [vmem:[#allocation6 + $0x98] sm:$0xff]  ;;  %v527_v28 = vpack.c.bf16 %v177_v25, %v175_v24  ;;  %v80_v30 = vld [vmem:[#allocation6 + $0x80] sm:$0xff]  ;;  %v176_v31 = vld [vmem:[#allocation6 + $0x110] sm:$0xff]  ;;  %p706_p0 = pnand %p705_p13, %p699_p10 }
  0x3f   :  { %502 = vmatpush1.bf16.msra.mxu0 %v501_v14  ;;  %v82_v33 = vld [vmem:[#allocation6 + $0x90] sm:$0xff]  ;;  %v529_v34 = vpack.c.bf16 %v176_v31, %v174_v29  ;;  %v179_v35 = vld [vmem:[#allocation6 + $0x128] sm:$0xff]  ;;  %v181_v36 = vld [vmem:[#allocation6 + $0x138] sm:$0xff]  ;;  %v511_v37 = vpack.c.bf16 %v83_v27, %v81_v26 }
  0x40   :  { %504 = vmatprep.subr.bf16.mxu0 %v503_v15  ;;  %528 = vmatprep.subr.bf16.mxu1 %v527_v28  ;;  %v531_v38 = vpack.c.bf16 %v181_v36, %v179_v35  ;;  %v178_v39 = vld [vmem:[#allocation6 + $0x120] sm:$0xff]  ;;  %v180_v40 = vld [vmem:[#allocation6 + $0x130] sm:$0xff]  ;;  %v183_v41 = vld [vmem:[#allocation6 + $0x148] sm:$0xff]  ;;  %v513_v49 = vpack.c.bf16 %v82_v33, %v80_v30 }
  0x41   :  { %v85_v42 = vld [vmem:[#allocation6 + $0xa8] sm:$0xff]  ;;  %v87_v43 = vld [vmem:[#allocation6 + $0xb8] sm:$0xff]  ;;  %530 = vmatpush1.bf16.msra.mxu1 %v529_v34  ;;  %v533_v44 = vpack.c.bf16 %v180_v40, %v178_v39  ;;  %v182_v47 = vld [vmem:[#allocation6 + $0x140] sm:$0xff] }
  0x42   :  { %v185_v45 = vld [vmem:[#allocation6 + $0x158] sm:$0xff]  ;;  %532 = vmatprep.subr.bf16.mxu1 %v531_v38  ;;  %v184_v48 = vld [vmem:[#allocation6 + $0x150] sm:$0xff]  ;;  %v187_v50 = vld [vmem:[#allocation6 + $0x168] sm:$0xff]  ;;  %v515_v52 = vpack.c.bf16 %v87_v43, %v85_v42 }
  0x43   :  { %506 = vmatpush1.bf16.msra.mxu0 %v505_v20  ;;  %v535_v46 = vpack.c.bf16 %v185_v45, %v183_v41  ;;  %v189_v51 = vld [vmem:[#allocation6 + $0x178] sm:$0xff]  ;;  %v84_v53 = vld [vmem:[#allocation6 + $0xa0] sm:$0xff]  ;;  %v86_v54 = vld [vmem:[#allocation6 + $0xb0] sm:$0xff]  ;;  %v537_v57 = vpack.c.bf16 %v184_v48, %v182_v47 }
  0x44   :  { %508 = vmatprep.subr.bf16.mxu0 %v507_v22  ;;  %v89_v55 = vld [vmem:[#allocation6 + $0xc8] sm:$0xff]  ;;  %v91_v56 = vld [vmem:[#allocation6 + $0xd8] sm:$0xff]  ;;  %v539_v58 = vpack.c.bf16 %v189_v51, %v187_v50  ;;  %v186_v59 = vld [vmem:[#allocation6 + $0x160] sm:$0xff]  ;;  %v517_v61 = vpack.c.bf16 %v86_v54, %v84_v53 }
  0x45   :  { %534 = vmatpush1.bf16.msra.mxu1 %v533_v44  ;;  %v188_v60 = vld [vmem:[#allocation6 + $0x170] sm:$0xff]  ;;  %v191_v62 = vld [vmem:[#allocation6 + $0x188] sm:$0xff]  ;;  %v193_v63 = vld [vmem:[#allocation6 + $0x198] sm:$0xff]  ;;  %v519_v1 = vpack.c.bf16 %v91_v56, %v89_v55 }
  0x46   :  { %536 = vmatprep.subr.bf16.mxu1 %v535_v46  ;;  %v88_v2 = vld [vmem:[#allocation6 + $0xc0] sm:$0xff]  ;;  %v90_v3 = vld [vmem:[#allocation6 + $0xd0] sm:$0xff]  ;;  %v93_v4 = vld [vmem:[#allocation6 + $0xe8] sm:$0xff]  ;;  %v541_v6 = vpack.c.bf16 %v188_v60, %v186_v59  ;;  %v543_v7 = vpack.c.bf16 %v193_v63, %v191_v62 }
  0x47   :  { %510 = vmatpush1.bf16.msra.mxu0 %v509_v32  ;;  %v95_v5 = vld [vmem:[#allocation6 + $0xf8] sm:$0xff]  ;;  %v190_v8 = vld [vmem:[#allocation6 + $0x180] sm:$0xff]  ;;  %v192_v9 = vld [vmem:[#allocation6 + $0x190] sm:$0xff]  ;;  %v521_v10 = vpack.c.bf16 %v90_v3, %v88_v2 }
  0x48   :  { %512 = vmatprep.subr.bf16.mxu0 %v511_v37  ;;  %v195_v11 = vld [vmem:[#allocation6 + $0x1a8] sm:$0xff]  ;;  %v197_v12 = vld [vmem:[#allocation6 + $0x1b8] sm:$0xff]  ;;  %v523_v13 = vpack.c.bf16 %v95_v5, %v93_v4  ;;  %v92_v14 = vld [vmem:[#allocation6 + $0xe0] sm:$0xff]  ;;  %v545_v16 = vpack.c.bf16 %v192_v9, %v190_v8 }
  0x49   :  { %538 = vmatpush1.bf16.msra.mxu1 %v537_v57  ;;  %v94_v15 = vld [vmem:[#allocation6 + $0xf0] sm:$0xff]  ;;  %v547_v17 = vpack.c.bf16 %v197_v12, %v195_v11  ;;  %v194_v18 = vld [vmem:[#allocation6 + $0x1a0] sm:$0xff]  ;;  %v199_v21 = vld [vmem:[#allocation6 + $0x1c8] sm:$0xff] }
  0x4a   :  { %540 = vmatprep.subr.bf16.mxu1 %v539_v58  ;;  %v196_v19 = vld [vmem:[#allocation6 + $0x1b0] sm:$0xff]  ;;  %v525_v20 = vpack.c.bf16 %v94_v15, %v92_v14  ;;  %v201_v22 = vld [vmem:[#allocation6 + $0x1d8] sm:$0xff]  ;;  %v198_v25 = vld [vmem:[#allocation6 + $0x1c0] sm:$0xff] }
  0x4b   :  { %514 = vmatpush1.bf16.msra.mxu0 %v513_v49  ;;  %v549_v23 = vpack.c.bf16 %v196_v19, %v194_v18  ;;  %v551_v24 = vpack.c.bf16 %v201_v22, %v199_v21  ;;  %v200_v26 = vld [vmem:[#allocation6 + $0x1d0] sm:$0xff]  ;;  %v203_v28 = vld [vmem:[#allocation6 + $0x1e8] sm:$0xff]  ;;  %v205_v29 = vld [vmem:[#allocation6 + $0x1f8] sm:$0xff] }
  0x4c   :  { %516 = vmatprep.subr.bf16.mxu0 %v515_v52  ;;  %v62_v27 = vld [vmem:[#allocation3] sm:$0xff]  ;;  %v553_v30 = vpack.c.bf16 %v200_v26, %v198_v25  ;;  %v555_v31 = vpack.c.bf16 %v205_v29, %v203_v28  ;;  %v202_v32 = vld [vmem:[#allocation6 + $0x1e0] sm:$0xff]  ;;  %v63_v34 = vld [vmem:[#allocation3 + $0x8] sm:$0xff] }
  0x4d   :  { %542 = vmatpush1.bf16.msra.mxu1 %v541_v6  ;;  %v204_v33 = vld [vmem:[#allocation6 + $0x1f0] sm:$0xff]  ;;  %v333_v36 = vld [vmem:[#allocation8 + $0x80] sm:$0xff]  ;;  %v334_v37 = vld [vmem:[#allocation8 + $0x88] sm:$0xff] }
  0x4e   :  { %544 = vmatprep.subr.bf16.mxu1 %v543_v7  ;;  %v557_v35 = vpack.c.bf16 %v204_v33, %v202_v32  ;;  %v559_v38 = vpack.c.bf16 %v334_v37, %v333_v36  ;;  %v317_v39 = vld [vmem:[#allocation8] sm:$0xff]  ;;  %v318_v40 = vld [vmem:[#allocation8 + $0x8] sm:$0xff]  ;;  %v335_v42 = vld [vmem:[#allocation8 + $0x90] sm:$0xff] }
  0x4f   :  { %518 = vmatpush1.bf16.msra.mxu0 %v517_v61  ;;  %v561_v41 = vpack.c.bf16 %v318_v40, %v317_v39  ;;  %v336_v43 = vld [vmem:[#allocation8 + $0x98] sm:$0xff]  ;;  %v319_v45 = vld [vmem:[#allocation8 + $0x10] sm:$0xff]  ;;  %v338_v48 = vld [vmem:[#allocation8 + $0xa8] sm:$0xff] }
  0x50   :  { %520 = vmatprep.subr.bf16.mxu0 %v519_v1  ;;  %v563_v44 = vpack.c.bf16 %v336_v43, %v335_v42  ;;  %v320_v46 = vld [vmem:[#allocation8 + $0x18] sm:$0xff]  ;;  %v321_v50 = vld [vmem:[#allocation8 + $0x20] sm:$0xff]  ;;  %v322_v51 = vld [vmem:[#allocation8 + $0x28] sm:$0xff] }
  0x51   :  { %546 = vmatpush1.bf16.msra.mxu1 %v545_v16  ;;  %v565_v47 = vpack.c.bf16 %v320_v46, %v319_v45  ;;  %v569_v52 = vpack.c.bf16 %v322_v51, %v321_v50  ;;  %v339_v53 = vld [vmem:[#allocation8 + $0xb0] sm:$0xff]  ;;  %v340_v54 = vld [vmem:[#allocation8 + $0xb8] sm:$0xff]  ;;  %v341_v59 = vld [vmem:[#allocation8 + $0xc0] sm:$0xff] }
  0x52   :  { %548 = vmatprep.subr.bf16.mxu1 %v547_v17  ;;  %v571_v55 = vpack.c.bf16 %v340_v54, %v339_v53  ;;  %v323_v56 = vld [vmem:[#allocation8 + $0x30] sm:$0xff]  ;;  %v324_v57 = vld [vmem:[#allocation8 + $0x38] sm:$0xff]  ;;  %v342_v60 = vld [vmem:[#allocation8 + $0xc8] sm:$0xff] }
  0x53   :  { %522 = vmatpush1.bf16.msra.mxu0 %v521_v10  ;;  %v573_v58 = vpack.c.bf16 %v324_v57, %v323_v56  ;;  %v575_v61 = vpack.c.bf16 %v342_v60, %v341_v59  ;;  %v325_v62 = vld [vmem:[#allocation8 + $0x40] sm:$0xff]  ;;  %v326_v63 = vld [vmem:[#allocation8 + $0x48] sm:$0xff]  ;;  %v343_v2 = vld [vmem:[#allocation8 + $0xd0] sm:$0xff] }
  0x54   :  { %524 = vmatprep.subr.bf16.mxu0 %v523_v13  ;;  %v577_v1 = vpack.c.bf16 %v326_v63, %v325_v62  ;;  %v344_v3 = vld [vmem:[#allocation8 + $0xd8] sm:$0xff]  ;;  %v327_v5 = vld [vmem:[#allocation8 + $0x50] sm:$0xff]  ;;  %v345_v8 = vld [vmem:[#allocation8 + $0xe0] sm:$0xff] }
  0x55   :  { %550 = vmatpush1.bf16.msra.mxu1 %v549_v23  ;;  %v579_v4 = vpack.c.bf16 %v344_v3, %v343_v2  ;;  %v328_v6 = vld [vmem:[#allocation8 + $0x58] sm:$0xff]  ;;  %v346_v9 = vld [vmem:[#allocation8 + $0xe8] sm:$0xff]  ;;  %v329_v11 = vld [vmem:[#allocation8 + $0x60] sm:$0xff] }
  0x56   :  { %552 = vmatprep.subr.bf16.mxu1 %v551_v24  ;;  %v581_v7 = vpack.c.bf16 %v328_v6, %v327_v5  ;;  %v583_v10 = vpack.c.bf16 %v346_v9, %v345_v8  ;;  %v330_v12 = vld [vmem:[#allocation8 + $0x68] sm:$0xff]  ;;  %v347_v14 = vld [vmem:[#allocation8 + $0xf0] sm:$0xff]  ;;  %v348_v15 = vld [vmem:[#allocation8 + $0xf8] sm:$0xff] }
  0x57   :  { %526 = vmatpush1.bf16.msra.mxu0 %v525_v20  ;;  %v585_v13 = vpack.c.bf16 %v330_v12, %v329_v11  ;;  %v587_v16 = vpack.c.bf16 %v348_v15, %v347_v14  ;;  %v331_v17 = vld [vmem:[#allocation8 + $0x70] sm:$0xff]  ;;  %v332_v18 = vld [vmem:[#allocation8 + $0x78] sm:$0xff] }
  0x58   :  { %560 = vmatprep.subr.bf16.mxu0 %v559_v38  ;;  %v589_v19 = vpack.c.bf16 %v332_v18, %v331_v17 }
  0x59   :  { %554 = vmatpush1.bf16.msra.mxu1 %v553_v30 }
  0x5a   :  { %161 = vmatmul.mubr.f32.vlgmr.msra.gmra.mrb[0].mxu0 %v62_v27  ;;  %556 = vmatprep.subr.bf16.mxu1 %v555_v31 }
  0x5b   :  { %166 = vmatprep.mubr.f32.mxu0 %v733_v0  ;;  %562 = vmatpush3.bf16.msra.mxu0 %v561_v41 }
  0x5c   :  { %564 = vmatprep.subr.bf16.mxu0 %v563_v44 }
  0x5d   :  { %558 = vmatpush1.bf16.msra.mxu1 %v557_v35 }
  0x5e   :  { %167 = vmatmul.mubr.f32.gmra.mrb[2].mxu0 %v63_v34  ;;  %591 = vmatprep.subr.bf16.mxu1 %v559_v38 }
  0x5f   :  { %566 = vmatpush3.bf16.msra.mxu0 %v565_v47 }
  0x60   :  { %271 = vmatmul.mubr.f32.vlgmr.msra.gmra.mrb[0].mxu1 %v62_v27 }
  0x61   :  { %276 = vmatprep.mubr.f32.mxu1 %v733_v0  ;;  %599 = vmatpush3.bf16.msra.mxu1 %v561_v41  ;;  %v337_v0 = vld [vmem:[#allocation8 + $0xa0] sm:$0xff] }
  0x62   :  { %592 = vmatprep.subr.bf16.mxu1 %v563_v44  ;;  %v567_v49 = vpack.c.bf16 %v338_v48, %v337_v0 }
  0x64   :  { %277 = vmatmul.mubr.f32.gmra.mrb[2].mxu1 %v63_v34  ;;  %568 = vmatprep.subr.bf16.mxu0 %v567_v49 }
  0x65   :  { %600 = vmatpush3.bf16.msra.mxu1 %v565_v47  ;;  %570 = vmatpush3.bf16.msra.mxu0 %v569_v52 }
  0x66   :  { %593 = vmatprep.subr.bf16.mxu1 %v567_v49  ;;  %572 = vmatprep.subr.bf16.mxu0 %v571_v55 }
  0x69   :  { %601 = vmatpush3.bf16.msra.mxu1 %v569_v52  ;;  %574 = vmatpush3.bf16.msra.mxu0 %v573_v58 }
  0x6a   :  { %594 = vmatprep.subr.bf16.mxu1 %v571_v55  ;;  %576 = vmatprep.subr.bf16.mxu0 %v575_v61 }
  0x6d   :  { %602 = vmatpush3.bf16.msra.mxu1 %v573_v58  ;;  %578 = vmatpush3.bf16.msra.mxu0 %v577_v1 }
  0x6e   :  { %595 = vmatprep.subr.bf16.mxu1 %v575_v61  ;;  %580 = vmatprep.subr.bf16.mxu0 %v579_v4 }
  0x71   :  { %603 = vmatpush3.bf16.msra.mxu1 %v577_v1  ;;  %582 = vmatpush3.bf16.msra.mxu0 %v581_v7 }
  0x72   :  { %596 = vmatprep.subr.bf16.mxu1 %v579_v4  ;;  %584 = vmatprep.subr.bf16.mxu0 %v583_v10 }
  0x75   :  { %604 = vmatpush3.bf16.msra.mxu1 %v581_v7  ;;  %586 = vmatpush3.bf16.msra.mxu0 %v585_v13 }
  0x76   :  { %597 = vmatprep.subr.bf16.mxu1 %v583_v10  ;;  %588 = vmatprep.subr.bf16.mxu0 %v587_v16 }
  0x79   :  { %605 = vmatpush3.bf16.msra.mxu1 %v585_v13  ;;  %590 = vmatpush3.bf16.msra.mxu0 %v589_v19 }
  0x7a   :  { %598 = vmatprep.subr.bf16.mxu1 %v587_v16 }
  0x7d   :  { %606 = vmatpush3.bf16.msra.mxu1 %v589_v19 }
 0x12d   :  { %v162_v20 = vpop.f32.mrb[0].mxu0 }
 0x12e   :  { %v453_v21 = vmul.f32 -1.442695, %v162_v20  ;;  %v164_v22 = vpop.f32.mrb[1].mxu0 }
 0x12f   :  { %v454_v23 = vmul.f32 -1.442695, %v164_v22 }
 0x130   :  { %616 = vpow2.f32 %v453_v21 }
 0x131   :  { %618 = vpow2.f32 %v454_v23  ;;  %v168_v24 = vpop.f32.mrb[2].mxu0 }
 0x132   :  { %v455_v25 = vmul.f32 -1.442695, %v168_v24  ;;  %v170_v26 = vpop.f32.mrb[3].mxu0 }
 0x133   :  { %v456_v27 = vmul.f32 -1.442695, %v170_v26  ;;  %v272_v28 = vpop.f32.mrb[0].mxu1 }
 0x134   :  { %620 = vpow2.f32 %v455_v25  ;;  %v274_v29 = vpop.f32.mrb[1].mxu1 }
 0x135   :  { %622 = vpow2.f32 %v456_v27 }
 0x137   :  { %v278_v33 = vpop.f32.mrb[2].mxu1 }
 0x138   :  { %v280_v35 = vpop.f32.mrb[3].mxu1 }
 0x13a   :  { %v617_v30 = vpop.eup %616 }
 0x13b   :  { %v619_v31 = vpop.eup %618  ;;  %v295_v32 = vadd.f32 1.0, %v617_v30 }
 0x13c   :  { %v296_v34 = vadd.f32 1.0, %v619_v31 }
 0x13d   :  { %624 = vrcp.f32 %v295_v32 }
 0x13e   :  { %v621_v36 = vpop.eup %620  ;;  %626 = vrcp.f32 %v296_v34 }
 0x13f   :  { %v623_v37 = vpop.eup %622  ;;  %v297_v38 = vadd.f32 1.0, %v621_v36 }
 0x140   :  { %v298_v39 = vadd.f32 1.0, %v623_v37 }
 0x141   :  { %628 = vrcp.f32 %v297_v38 }
 0x142   :  { %630 = vrcp.f32 %v298_v39 }
 0x147   :  { %v625_v40 = vpop.eup %624 }
 0x148   :  { %v627_v41 = vpop.eup %626  ;;  %v307_v42 = vmul.f32 %v625_v40, %v162_v20 }
 0x149   :  { %v308_v43 = vmul.f32 %v627_v41, %v164_v22 }
 0x14a   :  { %v311_v44 = vmul.f32 %v307_v42, %v272_v28 }
 0x14b   :  { %v629_v45 = vpop.eup %628  ;;  %v312_v46 = vmul.f32 %v308_v43, %v274_v29 }
 0x14c   :  { %v631_v47 = vpop.eup %630  ;;  %v309_v0 = vmul.f32 %v629_v45, %v168_v24 }
 0x14d   :  { %v310_v48 = vmul.f32 %v631_v47, %v170_v26  ;;  %413 = vmatprep.mubr.f32.mxu0 %v312_v46 }
 0x14e   :  { %v313_v49 = vmul.f32 %v309_v0, %v278_v33  ;;  %414 = vmatmul.mubr.f32.vlgmr.msra.gmra.mrb[4].mxu0 %v311_v44 }
 0x14f   :  { %v314_v50 = vmul.f32 %v310_v48, %v280_v35 }
 0x151   :  { %418 = vmatprep.mubr.f32.mxu1 %v314_v50 }
 0x152   :  { %419 = vmatmul.mubr.f32.vlgmr.msra.gmra.mrb[4].mxu1 %v313_v49 }
 0x221   :  { %v489_v51 = vpop.f32.mrb[4].mxu0 }
 0x222   :  { %v490_v52 = vpop.f32.mrb[5].mxu0 }
 0x223   :  { %v491_v53 = vadd.f32 %v490_v52, %v489_v51 }
 0x225   :  { %433 = vst [vmem:[#allocation9] sm:$0xff] %v491_v53  ;;  %v492_v54 = vpop.f32.mrb[4].mxu1 }
 0x226   :  { %v493_v55 = vpop.f32.mrb[5].mxu1 }
 0x227   :  { %v494_v56 = vadd.f32 %v493_v55, %v492_v54 }
 0x229   :  { %434 = vst [vmem:[#allocation9 + $0x8] sm:$0xff] %v494_v56 }
 0x22a   :  { %709 = shalt.err (!%p706_p0)
}
 0x22b   :  { %s710_s27 = scalar_lea.hbm %s819_s3, 256 }
 0x22c   :  { %p711_p1 = scmp.ne.s32.totalorder %s819_s3, %s710_s27  ;;  %p714_p2 = scmp.lt.u32.totalorder %s710_s27, %s819_s3 }
 0x22e   :  { %p716_p3 = pnand %p714_p2, %p711_p1 }
 0x230   :  { %719 = shalt.err (!%p716_p3)
}
 0x231   :  { %446 = dma.vmem_to_hbm [thread:$0]  %s441_s23, 256, %s819_s3, [#allocation5], %s730_s1, %s730_s1, %s731_s9  }
 0x232   :  { %724 = dma.done.wait [#allocation5], 256  }
 0x233   :  { %725 = vsyncadd [#allocation5], 4294967040 }
 0x234   :  { %450 = vsyncpa [#allocation4], 1 }
 0x235   :  { %451 = vsyncpa [#allocation7], 1 }
 0x236   :  { %452 = vsyncpa [#allocation5], 1 }

</bundles_post_ra>
